<compile_context>
chip_gen: v7x
topology: tpu7x:2x2x1
jax: 0.10.0
libtpu: 0.0.40
codegen_flags: <defaults>
</compile_context>

<pallas_src>
import functools

import jax
import jax.numpy as jnp
import numpy as np
from jax.experimental import pallas as pl
from jax.experimental.pallas import tpu as pltpu


# ----------------------------------------------------------------------------
# Anchor generation (standard Faster R-CNN anchor grid, host-side numpy).
# ----------------------------------------------------------------------------
def generate_anchor_base(base_size, ratios, scales):
    py = base_size / 2.0
    px = base_size / 2.0
    ab = np.zeros((len(ratios) * len(scales), 4), dtype=np.float32)
    for i, r in enumerate(ratios):
        for j, s in enumerate(scales):
            h = base_size * s * np.sqrt(r)
            w = base_size * s * np.sqrt(1.0 / r)
            idx = i * len(scales) + j
            ab[idx, 0] = py - h / 2.0
            ab[idx, 1] = px - w / 2.0
            ab[idx, 2] = py + h / 2.0
            ab[idx, 3] = px + w / 2.0
    return ab


def generate_anchors(feat_stride, H, W, ratios, scales):
    anchor_base = generate_anchor_base(feat_stride, ratios, scales)
    shift_y = np.arange(0, H * feat_stride, feat_stride)
    shift_x = np.arange(0, W * feat_stride, feat_stride)
    sx, sy = np.meshgrid(shift_x, shift_y)
    shift = np.stack((sy.ravel(), sx.ravel(), sy.ravel(), sx.ravel()), axis=1)
    A = anchor_base.shape[0]
    K = shift.shape[0]
    anchors = anchor_base.reshape((1, A, 4)) + shift.reshape((K, 1, 4))
    return anchors.reshape((K * A, 4)).astype(np.float32)


# ----------------------------------------------------------------------------
# Pallas kernel: one grid step per (batch, row-strip of H*W).
#
# Fused head column layout (bf16 output slab, padded to a 128-lane multiple):
#   [0   , 4A) : pred deltas
#   [4A  , 6A) : score logits, interleaved [bg0, fg0, bg1, fg1, ...]
#   [6A  , 7A) : fg softmax prob  = sigmoid(s_fg - s_bg)
#   [7A  , P ) : zero padding (lane alignment only)
# ----------------------------------------------------------------------------
def _rpn_kernel(A, xcol_ref, w1_ref, b1_ref, wh_ref, bh_ref, out_ref):
    # 3x3 conv (im2col'ed in the wrapper): (T, 9C) x (9C, M),
    # bf16 operands, f32 accumulation on the MXU.
    acc = jnp.dot(xcol_ref[0], w1_ref[...], preferred_element_type=jnp.float32)
    hidden = jnp.maximum(acc + b1_ref[...], 0.0)           # ReLU, f32 (T, M)

    # Single fused head matmul: [pred | interleaved scores | (s_fg - s_bg) | pad].
    heads = jnp.dot(hidden.astype(wh_ref.dtype), wh_ref[...],
                    preferred_element_type=jnp.float32) + bh_ref[...]  # (T, P)

    # 2-class softmax fg prob = sigmoid(s_fg - s_bg).  The logit diff already
    # sits in lanes [6A, 7A); compute the sigmoid there only (exp argument is
    # gated so the delta/score/pad lanes never see large magnitudes) and merge
    # back with a per-lane select -> ONE unmasked bf16 store.
    lane = jax.lax.broadcasted_iota(jnp.int32, heads.shape, 1)
    in_fg = jnp.logical_and(lane >= 6 * A, lane < 7 * A)
    exp_arg = jnp.where(in_fg, -heads, 0.0)
    sig = pl.reciprocal(1.0 + jnp.exp(exp_arg), approx=False)  # exact: feeds NMS ranking
    out_ref[0] = jnp.where(in_fg, sig, heads).astype(out_ref.dtype)


@functools.partial(jax.jit, static_argnums=(2, 3))
def rpn_pallas_forward(x_nchw, params, n_anchor, tile_hw=None):
    """Returns (rpn_deltas, rpn_scores, rpn_fg_softmax_scores) matching the
    PyTorch module's tensor outputs (before ProposalCreator)."""
    w1, b1, ws, bs, wp, bp = params
    N, C, H, W = x_nchw.shape
    M = w1.shape[-1]
    A = n_anchor
    HW = H * W

    # ---- row-strip tiling over H*W (pipeline depth / megacore sharding). ----
    if tile_hw is None:
        tile_hw = min(2048, HW)
        if N == 1:
            # keep >= 2 parallel grid steps for v7x's two TensorCores
            tile_hw = min(tile_hw, max(16, (HW + 1) // 2))
    tile_hw = max(16, (tile_hw // 16) * 16)     # bf16 packs (16,128) sublanes
    hw_pad = ((HW + tile_hw - 1) // tile_hw) * tile_hw
    n_tiles = hw_pad // tile_hw

    # ---- im2col in bf16 (early cast; fuses with the pad/slices under jit). --
    x = jnp.transpose(x_nchw, (0, 2, 3, 1)).astype(jnp.bfloat16)      # NHWC bf16
    xpad = jnp.pad(x, ((0, 0), (1, 1), (1, 1), (0, 0)))
    taps = [xpad[:, dy:dy + H, dx:dx + W, :]
            for dy in range(3) for dx in range(3)]
    xcol = jnp.concatenate(taps, axis=-1).reshape(N, HW, 9 * C)
    if hw_pad != HW:
        xcol = jnp.pad(xcol, ((0, 0), (0, hw_pad - HW), (0, 0)))

    # ---- fused head weights/biases, padded to a 128-lane multiple. ----------
    ws_bg, ws_fg = ws[:, 0::2], ws[:, 1::2]
    bs_bg, bs_fg = bs[:, 0::2], bs[:, 1::2]
    # scores stay interleaved so the wrapper split is a contiguous reshape
    w_heads = jnp.concatenate([wp, ws, ws_fg - ws_bg], axis=1)
    b_heads = jnp.concatenate([bp, bs, bs_fg - bs_bg], axis=1)
    ncols = 7 * A
    padded = ((ncols + 127) // 128) * 128
    w_heads = jnp.pad(w_heads, ((0, 0), (0, padded - ncols))).astype(jnp.bfloat16)
    b_heads = jnp.pad(b_heads, ((0, 0), (0, padded - ncols))).astype(jnp.float32)

    w1col = w1.reshape(9 * C, M).astype(jnp.bfloat16)     # HWIO -> (9C, M)
    b1v = b1.reshape(1, M).astype(jnp.float32)

    # ---- advisory cost estimate (bytes-dominated). --------------------------
    weight_bytes = (9 * C * M + M * padded) * 2 + (M + padded) * 4
    cost = pl.CostEstimate(
        flops=2 * N * hw_pad * (9 * C * M + M * padded),
        transcendentals=N * hw_pad * padded,
        bytes_accessed=N * hw_pad * (9 * C + padded) * 2 + weight_bytes,
    )

    # ---- VMEM budget: only raise the scoped limit when actually needed. -----
    lanes_in = ((9 * C + 127) // 128) * 128
    blk_bytes = (2 * tile_hw * (lanes_in + padded) * 2   # double-buffered in/out
                 + 2 * weight_bytes)
    cp_kwargs = dict(dimension_semantics=("parallel", "parallel"))
    if blk_bytes > 12 * 1024 * 1024:                     # past v5e's 16 MiB default
        cp_kwargs["vmem_limit_bytes"] = int(min(max(2 * blk_bytes, 32 << 20),
                                                56 << 20))

    kernel = functools.partial(_rpn_kernel, A)
    slab = pl.pallas_call(
        kernel,
        out_shape=jax.ShapeDtypeStruct((N, hw_pad, padded), jnp.bfloat16),
        grid=(N, n_tiles),
        in_specs=[
            pl.BlockSpec((1, tile_hw, 9 * C), lambda n, t: (n, t, 0)),  # im2col x
            pl.BlockSpec((9 * C, M), lambda n, t: (0, 0)),              # conv1 w
            pl.BlockSpec((1, M), lambda n, t: (0, 0)),                  # conv1 b
            pl.BlockSpec((M, padded), lambda n, t: (0, 0)),             # fused heads w
            pl.BlockSpec((1, padded), lambda n, t: (0, 0)),             # fused heads b
        ],
        out_specs=pl.BlockSpec((1, tile_hw, padded), lambda n, t: (n, t, 0)),
        compiler_params=pltpu.CompilerParams(**cp_kwargs),
        cost_estimate=cost,
    )(xcol, w1col, b1v, w_heads, b_heads)

    # ---- split the lane-dense bf16 slab back into module outputs (f32). -----
    slab = slab[:, :HW, :]
    rpn_deltas = slab[:, :, :4 * A].astype(jnp.float32).reshape(N, HW * A, 4)
    rpn_scores = slab[:, :, 4 * A:6 * A].astype(jnp.float32).reshape(N, HW * A, 2)
    rpn_fg = slab[:, :, 6 * A:7 * A].astype(jnp.float32).reshape(N, HW * A)
    return rpn_deltas, rpn_scores, rpn_fg


# ----------------------------------------------------------------------------
# Plain-JAX reference (for correctness check of the Pallas kernel).
# ----------------------------------------------------------------------------
def rpn_reference(x_nchw, params, n_anchor):
    w1, b1, ws, bs, wp, bp = params
    N, C, H, W = x_nchw.shape
    A = n_anchor
    x = jnp.transpose(x_nchw, (0, 2, 3, 1)).astype(jnp.float32)
    hidden = jax.lax.conv_general_dilated(
        x, w1, window_strides=(1, 1), padding="SAME",
        dimension_numbers=("NHWC", "HWIO", "NHWC"))
    hidden = jax.nn.relu(hidden + b1.reshape(1, 1, 1, -1))
    score = jnp.einsum("nhwc,co->nhwo", hidden, ws) + bs.reshape(1, 1, 1, -1)
    pred = jnp.einsum("nhwc,co->nhwo", hidden, wp) + bp.reshape(1, 1, 1, -1)
    rpn_deltas = pred.reshape(N, -1, 4)
    rpn_scores = score.reshape(N, -1, 2)
    sm = jax.nn.softmax(score.reshape(N, H, W, A, 2), axis=4)
    fg = sm[..., 1].reshape(N, -1)
    return rpn_deltas, rpn_scores, fg


if __name__ == "__main__":
    # Small shapes consistent with the module's forward.
    N, C_in, M_mid, H, W = 2, 16, 32, 16, 16
    ratios, scales = (0.5, 1, 2), (8, 16, 32)
    A = len(ratios) * len(scales)           # 9 anchors per location
    feat_stride = 16

    key = jax.random.PRNGKey(0)
    kx, k1, k2, k3 = jax.random.split(key, 4)

    # Deterministic normal_init(mean=0, stddev=0.01), biases zero.
    w1 = 0.01 * jax.random.normal(k1, (3, 3, C_in, M_mid), jnp.float32)   # HWIO
    b1 = jnp.zeros((1, M_mid), jnp.float32)
    ws = 0.01 * jax.random.normal(k2, (M_mid, 2 * A), jnp.float32)
    bs = jnp.zeros((1, 2 * A), jnp.float32)
    wp = 0.01 * jax.random.normal(k3, (M_mid, 4 * A), jnp.float32)
    bp = jnp.zeros((1, 4 * A), jnp.float32)
    params = (w1, b1, ws, bs, wp, bp)

    x = jax.random.normal(kx, (N, C_in, H, W), jnp.float32)   # PyTorch NCHW

    deltas, scores, fg = rpn_pallas_forward(x, params, A, None)
    jax.block_until_ready((deltas, scores, fg))

    anchors = generate_anchors(feat_stride, H, W, ratios, scales)   # (H*W*A, 4)
    assert anchors.shape == (H * W * A, 4)

    # Verify against a plain-JAX f32 reference (bf16 operands + bf16 output
    # slab in the kernel -> slightly looser tolerances).
    d_ref, s_ref, fg_ref = rpn_reference(x, params, A)
    np.testing.assert_allclose(np.asarray(deltas), np.asarray(d_ref),
                               rtol=2e-2, atol=3e-3)
    np.testing.assert_allclose(np.asarray(scores), np.asarray(s_ref),
                               rtol=2e-2, atol=3e-3)
    np.testing.assert_allclose(np.asarray(fg), np.asarray(fg_ref),
                               rtol=5e-2, atol=5e-3)

    assert deltas.shape == (N, H * W * A, 4)
    assert scores.shape == (N, H * W * A, 2)
    assert fg.shape == (N, H * W * A)

    print("KERNEL_OK")
</pallas_src>

<mosaic_0001>
module attributes {stable_mosaic.version = 11 : i64} {
  func.func @_rpn_kernel(%arg0: i32, %arg1: i32, %arg2: memref<1x256x144xbf16, #tpu.memory_space<vmem>>, %arg3: memref<144x32xbf16, #tpu.memory_space<vmem>>, %arg4: memref<1x32xf32, #tpu.memory_space<vmem>>, %arg5: memref<32x128xbf16, #tpu.memory_space<vmem>>, %arg6: memref<1x128xf32, #tpu.memory_space<vmem>>, %arg7: memref<1x256x128xbf16, #tpu.memory_space<vmem>>) attributes {dimension_semantics = [#tpu.dimension_semantics<parallel>, #tpu.dimension_semantics<parallel>], iteration_bounds = array<i64: 2, 1>, scalar_prefetch = 0 : i64, scratch_operands = 0 : i64, tpu.core_type = #tpu.core_type<tc>, window_params = [{transform_indices = @transform_0, window_bounds = array<i64: 1, 256, 144>}, {pipeline_mode = #tpu.pipeline_mode<synchronous>, transform_indices = @transform_1, window_bounds = array<i64: 144, 32>}, {pipeline_mode = #tpu.pipeline_mode<synchronous>, transform_indices = @transform_2, window_bounds = array<i64: 1, 32>}, {pipeline_mode = #tpu.pipeline_mode<synchronous>, transform_indices = @transform_3, window_bounds = array<i64: 32, 128>}, {pipeline_mode = #tpu.pipeline_mode<synchronous>, transform_indices = @transform_4, window_bounds = array<i64: 1, 128>}, {transform_indices = @transform_5, window_bounds = array<i64: 1, 256, 128>}]} {
    %c0 = arith.constant 0 : index
    %c0_0 = arith.constant 0 : index
    %c0_1 = arith.constant 0 : index
    %0 = vector.load %arg2[%c0, %c0_0, %c0_1] : memref<1x256x144xbf16, #tpu.memory_space<vmem>>, vector<1x256x144xbf16>
    %1 = vector.shape_cast %0 : vector<1x256x144xbf16> to vector<256x144xbf16>
    %c0_2 = arith.constant 0 : index
    %c0_3 = arith.constant 0 : index
    %2 = vector.load %arg3[%c0_2, %c0_3] : memref<144x32xbf16, #tpu.memory_space<vmem>>, vector<144x32xbf16>
    %cst = arith.constant dense<0.000000e+00> : vector<256x32xf32>
    %3 = tpu.matmul %1, %2, %cst {dimension_numbers = #tpu.dot_dimension_numbers<[1], [0], [0], [1], [0, 0, 1, 1], [], []>} : vector<256x144xbf16>, vector<144x32xbf16>, vector<256x32xf32> -> vector<256x32xf32>
    %c0_4 = arith.constant 0 : index
    %c0_5 = arith.constant 0 : index
    %4 = vector.load %arg4[%c0_4, %c0_5] : memref<1x32xf32, #tpu.memory_space<vmem>>, vector<1x32xf32>
    %5 = vector.broadcast %4 : vector<1x32xf32> to vector<256x32xf32>
    %6 = arith.addf %3, %5 : vector<256x32xf32>
    %cst_6 = arith.constant 0.000000e+00 : f32
    %7 = vector.broadcast %cst_6 : f32 to vector<256x32xf32>
    %8 = arith.maximumf %6, %7 : vector<256x32xf32>
    %9 = arith.truncf %8 : vector<256x32xf32> to vector<256x32xbf16>
    %c0_7 = arith.constant 0 : index
    %c0_8 = arith.constant 0 : index
    %10 = vector.load %arg5[%c0_7, %c0_8] : memref<32x128xbf16, #tpu.memory_space<vmem>>, vector<32x128xbf16>
    %cst_9 = arith.constant dense<0.000000e+00> : vector<256x128xf32>
    %11 = tpu.matmul %9, %10, %cst_9 {dimension_numbers = #tpu.dot_dimension_numbers<[1], [0], [0], [1], [0, 0, 1, 1], [], []>} : vector<256x32xbf16>, vector<32x128xbf16>, vector<256x128xf32> -> vector<256x128xf32>
    %c0_10 = arith.constant 0 : index
    %c0_11 = arith.constant 0 : index
    %12 = vector.load %arg6[%c0_10, %c0_11] : memref<1x128xf32, #tpu.memory_space<vmem>>, vector<1x128xf32>
    %13 = vector.broadcast %12 : vector<1x128xf32> to vector<256x128xf32>
    %14 = arith.addf %11, %13 : vector<256x128xf32>
    %15 = tpu.iota {dimensions = array<i32: 1>} : vector<256x128xi32>
    %c54_i32 = arith.constant 54 : i32
    %16 = vector.broadcast %c54_i32 : i32 to vector<256x128xi32>
    %17 = arith.cmpi sge, %15, %16 : vector<256x128xi32>
    %c63_i32 = arith.constant 63 : i32
    %18 = vector.broadcast %c63_i32 : i32 to vector<256x128xi32>
    %19 = arith.cmpi slt, %15, %18 : vector<256x128xi32>
    %20 = arith.andi %17, %19 : vector<256x128xi1>
    %cst_12 = arith.constant 0.000000e+00 : f32
    %21 = vector.broadcast %cst_12 : f32 to vector<256x128xf32>
    %22 = arith.subf %21, %14 : vector<256x128xf32>
    %cst_13 = arith.constant 0.000000e+00 : f32
    %23 = vector.broadcast %cst_13 : f32 to vector<256x128xf32>
    %24 = arith.select %20, %22, %23 : vector<256x128xi1>, vector<256x128xf32>
    %25 = math.exp %24 : vector<256x128xf32>
    %cst_14 = arith.constant 1.000000e+00 : f32
    %26 = vector.broadcast %cst_14 : f32 to vector<256x128xf32>
    %27 = arith.addf %26, %25 : vector<256x128xf32>
    %28 = tpu.reciprocal %27 : vector<256x128xf32> -> vector<256x128xf32>
    %29 = arith.select %20, %28, %14 : vector<256x128xi1>, vector<256x128xf32>
    %30 = arith.truncf %29 : vector<256x128xf32> to vector<256x128xbf16>
    %c0_15 = arith.constant 0 : index
    %c0_16 = arith.constant 0 : index
    %c0_17 = arith.constant 0 : index
    %31 = vector.load %arg7[%c0_15, %c0_16, %c0_17] : memref<1x256x128xbf16, #tpu.memory_space<vmem>>, vector<1x256x128xbf16>
    %32 = vector.shape_cast %31 : vector<1x256x128xbf16> to vector<256x128xbf16>
    %33 = vector.shape_cast %30 : vector<256x128xbf16> to vector<1x256x128xbf16>
    tpu.vector_store %arg7[%c0_15, %c0_16, %c0_17], %33 {strides = array<i32>} : memref<1x256x128xbf16, #tpu.memory_space<vmem>>, vector<1x256x128xbf16>,
    return
  }
  func.func @transform_0(%arg0: i32, %arg1: i32) -> (i32, i32, i32) {
    %c0_i32 = arith.constant 0 : i32
    %c0_i32_0 = arith.constant 0 : i32
    return %arg0, %arg1, %c0_i32 : i32, i32, i32
  }
  func.func @transform_1(%arg0: i32, %arg1: i32) -> (i32, i32) {
    %c0_i32 = arith.constant 0 : i32
    %c0_i32_0 = arith.constant 0 : i32
    %c0_i32_1 = arith.constant 0 : i32
    return %c0_i32, %c0_i32_0 : i32, i32
  }
  func.func @transform_2(%arg0: i32, %arg1: i32) -> (i32, i32) {
    %c0_i32 = arith.constant 0 : i32
    %c0_i32_0 = arith.constant 0 : i32
    %c0_i32_1 = arith.constant 0 : i32
    return %c0_i32, %c0_i32_0 : i32, i32
  }
  func.func @transform_3(%arg0: i32, %arg1: i32) -> (i32, i32) {
    %c0_i32 = arith.constant 0 : i32
    %c0_i32_0 = arith.constant 0 : i32
    %c0_i32_1 = arith.constant 0 : i32
    return %c0_i32, %c0_i32_0 : i32, i32
  }
  func.func @transform_4(%arg0: i32, %arg1: i32) -> (i32, i32) {
    %c0_i32 = arith.constant 0 : i32
    %c0_i32_0 = arith.constant 0 : i32
    %c0_i32_1 = arith.constant 0 : i32
    return %c0_i32, %c0_i32_0 : i32, i32
  }
  func.func @transform_5(%arg0: i32, %arg1: i32) -> (i32, i32, i32) {
    %c0_i32 = arith.constant 0 : i32
    %c0_i32_0 = arith.constant 0 : i32
    return %arg0, %arg1, %c0_i32 : i32, i32, i32
  }
}

</mosaic_0001>

<bundles_post_ra>
// kernel: sub.3
= control target key start
LH: loop header
LB: loop body
LE: loop exit
PB: predicated region body
PF: predicated region fallthrough
CT: control target
= control target key end

     0   :  { %s34_s0 = inlined_call_operand.vmem [shape: f32[1,9], index: 0, kind: input, shape index: {}]   ;;  %s35_s1 = inlined_call_operand.vmem [shape: f32[1,9], index: 1, kind: input, shape index: {}]   ;;  %s36_s2 = inlined_call_operand.vmem [shape: f32[1,9], index: 2, kind: output, shape index: {}]  }
   0x1   :  { %v3_v0 = vld [vmem:[%s34_s0] sm:$0x1] }
   0x2   :  { %v4_v1 = vld [vmem:[%s35_s1] sm:$0x1] }
   0x3   :  { %v7_v2 = vsub.f32 %v3_v0, %v4_v1 }
   0x5   :  { %9 = vst [vmem:[%s36_s2] sm:$0x1] %v7_v2 }

// kernel: rpn_pallas_forward.1
= control target key start
LH: loop header
LB: loop body
LE: loop exit
PB: predicated region body
PF: predicated region fallthrough
CT: control target
= control target key end

     0   :  { %s2081_s18 = smov 0   ;;  %s2083_s19 = smov 0   ;;  %s2581_s0 = inlined_call_operand.vmem [shape: bf16[2,256,144], index: 0, kind: input, shape index: {}]   ;;  %s2582_s1 = inlined_call_operand.vmem [shape: bf16[144,32], index: 1, kind: input, shape index: {}]   ;;  %s2583_s2 = inlined_call_operand.vmem [shape: f32[1,32], index: 2, kind: input, shape index: {}]   ;;  %s2584_s3 = inlined_call_operand.vmem [shape: bf16[32,128], index: 3, kind: input, shape index: {}]   ;;  %s2585_s4 = inlined_call_operand.vmem [shape: f32[1,128], index: 4, kind: input, shape index: {}]   ;;  %s2586_s5 = inlined_call_operand.vmem [shape: bf16[2,256,128], index: 5, kind: output, shape index: {}]  }
   0x1   :  { %s2085_s20 = smov 0  }
   0x2 LB: > { %s27_s21 = sadd.s32 1, %s2044_s19  ;;  %p1497_p0 = scmp.ge.s32.totalorder %s2048_s20, 1  ;;  %s2048_s20 = sphi %s2085_s20, %s15_s20   ;;  %s2044_s19 = sphi %s2083_s19, %s2590_s19   ;;  %s2040_s18 = sphi %s2081_s18, %s2589_s18  }
   0x3   : > { %p29_p1 = scmp.ge.s32.totalorder %s27_s21, 2  ;;  %p209_p2 = scmp.lt.s32.totalorder %s2048_s20, 3 }
   0x5   : > { %s2592_s21 = smov (%p29_p1, %s27_s21), 0  ;;  %p210_p3 = pnand %p1497_p0, %p209_p2 }
   0x6   : > { %v1839_v0 = vld [vmem:[%s2582_s1] sm:$0xff] (!%p210_p3)   ;;  %v2050_v1 = vmov (!%p210_p3), 0   ;;  %p247_p4 = scmp.lt.s32.totalorder (!%p210_p3), %s2040_s18, 1  ;;  %v1840_v2 = vld [vmem:[%s2582_s1 + $0x8] sm:$0xff] (!%p210_p3)   ;;  %v1841_v3 = vld [vmem:[%s2582_s1 + $0x10] sm:$0xff] (!%p210_p3)   ;;  %vm523_vm0 = vcmask (!%p210_p3), 130048  }
   0x7   : > { %213 = sbr.rel (%p210_p3) target bundleno = 624 (0x270), region = 40  ;;  %572 = vmatprep.subr.bf16.mxu0 (!%p210_p3), %v2050_v1  ;;  %1796 = vmatprep.subr.bf16.mxu1 (!%p210_p3), %v2050_v1  ;;  %v1842_v4 = vld [vmem:[%s2582_s1 + $0x18] sm:$0xff] (!%p210_p3)   ;;  %v1843_v6 = vld [vmem:[%s2582_s1 + $0x20] sm:$0xff] (!%p210_p3)   ;;  %v1844_v7 = vld [vmem:[%s2582_s1 + $0x28] sm:$0xff] (!%p210_p3)   ;;  %vm804_vm1 = vcmask (!%p210_p3), 261120  }
   0x8   : > { %573 = vmatpush1.bf16.msra.mxu0 (!%p210_p3), %v1839_v0  ;;  %1805 = vmatpush1.bf16.msra.mxu1 (!%p210_p3), %v1839_v0  ;;  %v1845_v8 = vld [vmem:[%s2582_s1 + $0x30] sm:$0xff] (!%p210_p3)   ;;  %v1846_v10 = vld [vmem:[%s2582_s1 + $0x38] sm:$0xff] (!%p210_p3)   ;;  %v1847_v11 = vld [vmem:[%s2582_s1 + $0x40] sm:$0xff] (!%p210_p3)  }
   0x9   : > { %574 = vmatprep.subr.bf16.mxu0 (!%p210_p3), %v2050_v1  ;;  %1797 = vmatprep.subr.bf16.mxu1 (!%p210_p3), %v2050_v1  ;;  %v1896_v42 = vld [vmem:[%s2584_s3] sm:$0xff] (!%p210_p3)   ;;  %v1897_v43 = vld [vmem:[%s2584_s3 + $0x8] sm:$0xff] (!%p210_p3)  }
   0xa   : > { %v2191_v44 = vld [vmem:[%s2583_s2] ss:$0 sm:$0xff] (!%p210_p3) }
   0xc   : > { %575 = vmatpush1.bf16.msra.mxu0 (!%p210_p3), %v1840_v2  ;;  %1806 = vmatpush1.bf16.msra.mxu1 (!%p210_p3), %v1840_v2 }
   0xd   : > { %576 = vmatprep.subr.bf16.mxu0 (!%p210_p3), %v2050_v1  ;;  %1798 = vmatprep.subr.bf16.mxu1 (!%p210_p3), %v2050_v1 }
   0xe   : > { %s2594_s18 = smov (!%p247_p4, %s2040_s18), 1 }
   0xf   : > { %s1613_s26 = sshll.u32 %s2594_s18, 8 }
  0x10   : > { %s2114_s6 = scalar_lea.vmem %s2581_s0, %s1613_s26  ;;  %577 = vmatpush1.bf16.msra.mxu0 %v1841_v3  ;;  %1807 = vmatpush1.bf16.msra.mxu1 %v1841_v3 }
  0x11   : > { %v1850_v5 = vld [vmem:[%s2114_s6 + $0x4] ss:$8 sps:$4 sm:$0xff]   ;;  %578 = vmatprep.subr.bf16.mxu0 %v2050_v1  ;;  %1799 = vmatprep.subr.bf16.mxu1 %v2050_v1  ;;  %v1848_v12 = vld [vmem:[%s2114_s6] ss:$8 sps:$4 sm:$0xff]   ;;  %v1851_v14 = vld [vmem:[%s2114_s6 + $0x14] ss:$8 sps:$4 sm:$0xff]  }
  0x12   : > { %1544 = vmatprep.mubr.msk.bf16.mxu0 %vm523_vm0, %v1850_v5  ;;  %v1880_v9 = vld [vmem:[%s2114_s6 + $0xc4] ss:$8 sps:$4 sm:$0xff]   ;;  %v1878_v13 = vld [vmem:[%s2114_s6 + $0xc0] ss:$8 sps:$4 sm:$0xff]   ;;  %v1884_v15 = vld [vmem:[%s2114_s6 + $0xd4] ss:$8 sps:$4 sm:$0xff]  }
  0x13   : > { %1556 = vmatprep.mubr.msk.bf16.mxu1 %vm523_vm0, %v1880_v9  ;;  %v1853_v16 = vld [vmem:[%s2114_s6 + $0x10] ss:$8 sps:$4 sm:$0xff]   ;;  %v1854_v18 = vld [vmem:[%s2114_s6 + $0x24] ss:$8 sps:$4 sm:$0xff]   ;;  %v1856_v20 = vld [vmem:[%s2114_s6 + $0x20] ss:$8 sps:$4 sm:$0xff]  }
  0x14   : > { %579 = vmatpush1.bf16.msra.mxu0 %v1842_v4  ;;  %1808 = vmatpush1.bf16.msra.mxu1 %v1842_v4  ;;  %v1886_v17 = vld [vmem:[%s2114_s6 + $0xd0] ss:$8 sps:$4 sm:$0xff]   ;;  %v1890_v19 = vld [vmem:[%s2114_s6 + $0xe4] ss:$8 sps:$4 sm:$0xff]   ;;  %v1892_v21 = vld [vmem:[%s2114_s6 + $0xe0] ss:$8 sps:$4 sm:$0xff]  }
  0x15   : > { %580 = vmatprep.subr.bf16.mxu0 %v2050_v1  ;;  %1800 = vmatprep.subr.bf16.mxu1 %v2050_v1  ;;  %v1857_v22 = vld [vmem:[%s2114_s6 + $0x34] ss:$8 sps:$4 sm:$0xff]   ;;  %v1859_v24 = vld [vmem:[%s2114_s6 + $0x30] ss:$8 sps:$4 sm:$0xff]   ;;  %v1860_v26 = vld [vmem:[%s2114_s6 + $0x44] ss:$8 sps:$4 sm:$0xff]  }
  0x16   : > { %v1893_v23 = vld [vmem:[%s2114_s6 + $0xf4] ss:$8 sps:$4 sm:$0xff]   ;;  %v1895_v25 = vld [vmem:[%s2114_s6 + $0xf0] ss:$8 sps:$4 sm:$0xff]   ;;  %v1862_v27 = vld [vmem:[%s2114_s6 + $0x40] ss:$8 sps:$4 sm:$0xff]  }
  0x17   : > { %v1863_v28 = vld [vmem:[%s2114_s6 + $0x54] ss:$8 sps:$4 sm:$0xff]   ;;  %v1865_v29 = vld [vmem:[%s2114_s6 + $0x50] ss:$8 sps:$4 sm:$0xff]   ;;  %v1866_v30 = vld [vmem:[%s2114_s6 + $0x64] ss:$8 sps:$4 sm:$0xff]  }
  0x18   : > { %581 = vmatpush1.bf16.msra.mxu0 %v1843_v6  ;;  %1809 = vmatpush1.bf16.msra.mxu1 %v1843_v6  ;;  %v1868_v31 = vld [vmem:[%s2114_s6 + $0x60] ss:$8 sps:$4 sm:$0xff]   ;;  %v1869_v32 = vld [vmem:[%s2114_s6 + $0x74] ss:$8 sps:$4 sm:$0xff]   ;;  %v1871_v33 = vld [vmem:[%s2114_s6 + $0x70] ss:$8 sps:$4 sm:$0xff]  }
  0x19   : > { %582 = vmatprep.subr.bf16.mxu0 %v2050_v1  ;;  %1801 = vmatprep.subr.bf16.mxu1 %v2050_v1  ;;  %v1872_v34 = vld [vmem:[%s2114_s6 + $0x84] ss:$8 sps:$4 sm:$0xff]   ;;  %v1874_v35 = vld [vmem:[%s2114_s6 + $0x80] ss:$8 sps:$4 sm:$0xff]   ;;  %v1875_v36 = vld [vmem:[%s2114_s6 + $0x94] ss:$8 sps:$4 sm:$0xff]  }
  0x1a   : > { %v1877_v37 = vld [vmem:[%s2114_s6 + $0x90] ss:$8 sps:$4 sm:$0xff]   ;;  %v1881_v38 = vld [vmem:[%s2114_s6 + $0xa4] ss:$8 sps:$4 sm:$0xff]   ;;  %v1883_v39 = vld [vmem:[%s2114_s6 + $0xa0] ss:$8 sps:$4 sm:$0xff]  }
  0x1b   : > { %v1887_v40 = vld [vmem:[%s2114_s6 + $0xb4] ss:$8 sps:$4 sm:$0xff]   ;;  %v1889_v41 = vld [vmem:[%s2114_s6 + $0xb0] ss:$8 sps:$4 sm:$0xff]   ;;  %s1614_s6 = sshll.u32 %s2594_s18, 7 }
  0x1c   : > { %583 = vmatpush1.bf16.msra.mxu0 %v1844_v7  ;;  %1810 = vmatpush1.bf16.msra.mxu1 %v1844_v7  ;;  %s2323_s18 = scalar_lea.vmem %s2586_s5, %s1614_s6 }
  0x1d   : > { %584 = vmatprep.subr.bf16.mxu0 %v2050_v1  ;;  %1802 = vmatprep.subr.bf16.mxu1 %v2050_v1 }
  0x20   : > { %585 = vmatpush1.bf16.msra.mxu0 %v1845_v8  ;;  %1811 = vmatpush1.bf16.msra.mxu1 %v1845_v8 }
  0x21   : > { %586 = vmatprep.subr.bf16.mxu0 %v2050_v1  ;;  %1803 = vmatprep.subr.bf16.mxu1 %v2050_v1 }
  0x24   : > { %587 = vmatpush1.bf16.msra.mxu0 %v1846_v10  ;;  %1812 = vmatpush1.bf16.msra.mxu1 %v1846_v10 }
  0x25   : > { %588 = vmatprep.subr.bf16.mxu0 %v2050_v1  ;;  %1804 = vmatprep.subr.bf16.mxu1 %v2050_v1 }
  0x28   : > { %589 = vmatpush1.bf16.msra.mxu0 %v1847_v11  ;;  %1813 = vmatpush1.bf16.msra.mxu1 %v1847_v11 }
  0x29   : > { %1760 = vmatprep.subr.bf16.mxu1 %v1896_v42 }
  0x2b   : > { %605 = vmatmul.mubr.bf16.vlgmr.msra.gmra.mrb[0].mxu0 %v1848_v12  ;;  %701 = vmatmul.mubr.bf16.vlgmr.msra.gmra.mrb[0].mxu1 %v1878_v13 }
  0x2c   : > { %1545 = vmatprep.mubr.msk.bf16.mxu0 %vm523_vm0, %v1851_v14  ;;  %1557 = vmatprep.mubr.msk.bf16.mxu1 %vm523_vm0, %v1884_v15 }
  0x2d   : > { %1761 = vmatpush3.bf16.msra.mxu1 %v1896_v42 }
  0x2e   : > { %1762 = vmatprep.subr.bf16.mxu1 %v1897_v43 }
  0x31   : > { %1763 = vmatpush3.bf16.msra.mxu1 %v1897_v43 }
  0x33   : > { %613 = vmatmul.mubr.bf16.gmra.mrb[4].mxu0 %v1853_v16  ;;  %709 = vmatmul.mubr.bf16.gmra.mrb[4].mxu1 %v1886_v17 }
  0x34   : > { %1546 = vmatprep.mubr.msk.bf16.mxu0 %vm523_vm0, %v1854_v18  ;;  %1558 = vmatprep.mubr.msk.bf16.mxu1 %vm523_vm0, %v1890_v19 }
  0x3b   : > { %621 = vmatmul.mubr.bf16.gmra.mrb[8].mxu0 %v1856_v20  ;;  %717 = vmatmul.mubr.bf16.gmra.mrb[8].mxu1 %v1892_v21 }
  0x3c   : > { %1547 = vmatprep.mubr.msk.bf16.mxu0 %vm523_vm0, %v1857_v22  ;;  %1559 = vmatprep.mubr.msk.bf16.mxu1 %vm523_vm0, %v1893_v23 }
  0x43   : > { %629 = vmatmul.mubr.bf16.gmra.mrb[12].mxu0 %v1859_v24  ;;  %725 = vmatmul.mubr.bf16.gmra.mrb[12].mxu1 %v1895_v25 }
  0x44   : > { %1548 = vmatprep.mubr.msk.bf16.mxu0 %vm523_vm0, %v1860_v26 }
  0x4b   : > { %637 = vmatmul.mubr.bf16.gmra.mrb[16].mxu0 %v1862_v27 }
  0x4c   : > { %1549 = vmatprep.mubr.msk.bf16.mxu0 %vm523_vm0, %v1863_v28 }
  0x53   : > { %645 = vmatmul.mubr.bf16.gmra.mrb[20].mxu0 %v1865_v29 }
  0x54   : > { %1550 = vmatprep.mubr.msk.bf16.mxu0 %vm523_vm0, %v1866_v30 }
  0x5b   : > { %653 = vmatmul.mubr.bf16.gmra.mrb[24].mxu0 %v1868_v31 }
  0x5c   : > { %1551 = vmatprep.mubr.msk.bf16.mxu0 %vm523_vm0, %v1869_v32 }
  0x63   : > { %661 = vmatmul.mubr.bf16.gmra.mrb[28].mxu0 %v1871_v33 }
  0x64   : > { %1552 = vmatprep.mubr.msk.bf16.mxu0 %vm523_vm0, %v1872_v34 }
  0x6b   : > { %669 = vmatmul.mubr.bf16.gmra.mrb[32].mxu0 %v1874_v35 }
  0x6c   : > { %1553 = vmatprep.mubr.msk.bf16.mxu0 %vm523_vm0, %v1875_v36 }
  0x73   : > { %677 = vmatmul.mubr.bf16.gmra.mrb[36].mxu0 %v1877_v37 }
  0x74   : > { %1554 = vmatprep.mubr.msk.bf16.mxu0 %vm523_vm0, %v1881_v38 }
  0x7b   : > { %685 = vmatmul.mubr.bf16.gmra.mrb[40].mxu0 %v1883_v39 }
  0x7c   : > { %1555 = vmatprep.mubr.msk.bf16.mxu0 %vm523_vm0, %v1887_v40 }
  0x83   : > { %693 = vmatmul.mubr.bf16.gmra.mrb[44].mxu0 %v1889_v41 }
  0xfe   : > { %v606_v45 = vpop.f32.mrb[0].mxu0  ;;  %v702_v46 = vpop.f32.mrb[0].mxu1 }
  0xff   : > { %v607_v47 = vadd.f32 %v2191_v44, %v606_v45  ;;  %v608_v48 = vpop.f32.mrb[1].mxu0  ;;  %v703_v49 = vadd.f32 %v2191_v44, %v702_v46  ;;  %v704_v50 = vpop.f32.mrb[1].mxu1 }
 0x100   : > { %v609_v51 = vpop.f32.mrb[2].mxu0  ;;  %v705_v52 = vpop.f32.mrb[2].mxu1 }
 0x101   : > { %v610_v53 = vadd.f32 %v2191_v44, %v609_v51  ;;  %v611_v54 = vpop.f32.mrb[3].mxu0  ;;  %v757_v55 = vmax.f32 %v703_v49, 0.0  ;;  %v706_v56 = vadd.f32 %v2191_v44, %v705_v52  ;;  %v707_v57 = vpop.f32.mrb[3].mxu1  ;;  %v733_v58 = vmax.f32 %v607_v47, 0.0 }
 0x103   : > { %v734_v59 = vmax.f32 %v610_v53, 0.0  ;;  %v758_v60 = vmax.f32 %v706_v56, 0.0 }
 0x105   : > { %v765_v61 = vpack.c.bf16 %v734_v59, %v733_v58  ;;  %v2197_v62 = vpack.c.bf16 %v758_v60, %v757_v55 }
 0x106   : > { %v614_v63 = vpop.f32.mrb[4].mxu0  ;;  %v710_v0 = vpop.f32.mrb[4].mxu1 }
 0x107   : > { %v615_v1 = vadd.f32 %v2191_v44, %v614_v63  ;;  %v616_v2 = vpop.f32.mrb[5].mxu0  ;;  %1764 = vmatprep.mubr.msk.bf16.mxu1 %vm804_vm1, %v765_v61  ;;  %v711_v3 = vadd.f32 %v2191_v44, %v710_v0  ;;  %v712_v4 = vpop.f32.mrb[5].mxu1 }
 0x108   : > { %v617_v5 = vpop.f32.mrb[6].mxu0  ;;  %v713_v6 = vpop.f32.mrb[6].mxu1 }
 0x109   : > { %v618_v7 = vadd.f32 %v2191_v44, %v617_v5  ;;  %v619_v8 = vpop.f32.mrb[7].mxu0  ;;  %v759_v9 = vmax.f32 %v711_v3, 0.0  ;;  %v714_v10 = vadd.f32 %v2191_v44, %v713_v6  ;;  %v715_v11 = vpop.f32.mrb[7].mxu1  ;;  %v735_v12 = vmax.f32 %v615_v1, 0.0 }
 0x10b   : > { %v736_v13 = vmax.f32 %v618_v7, 0.0  ;;  %v760_v14 = vmax.f32 %v714_v10, 0.0 }
 0x10d   : > { %v766_v15 = vpack.c.bf16 %v736_v13, %v735_v12  ;;  %v2204_v16 = vpack.c.bf16 %v760_v14, %v759_v9 }
 0x10e   : > { %v622_v17 = vpop.f32.mrb[8].mxu0  ;;  %v718_v18 = vpop.f32.mrb[8].mxu1 }
 0x10f   : > { %v623_v19 = vadd.f32 %v2191_v44, %v622_v17  ;;  %v624_v20 = vpop.f32.mrb[9].mxu0  ;;  %1765 = vmatmul.mubr.msk.bf16.vlgmr.msra.gmra.mrb[16].mxu1 %vm804_vm1, %v766_v15  ;;  %v719_v21 = vadd.f32 %v2191_v44, %v718_v18  ;;  %v720_v22 = vpop.f32.mrb[9].mxu1 }
 0x110   : > { %v625_v23 = vpop.f32.mrb[10].mxu0  ;;  %v721_v24 = vpop.f32.mrb[10].mxu1 }
 0x111   : > { %v626_v25 = vadd.f32 %v2191_v44, %v625_v23  ;;  %v627_v26 = vpop.f32.mrb[11].mxu0  ;;  %v761_v27 = vmax.f32 %v719_v21, 0.0  ;;  %v722_v28 = vadd.f32 %v2191_v44, %v721_v24  ;;  %v723_v29 = vpop.f32.mrb[11].mxu1  ;;  %v737_v30 = vmax.f32 %v623_v19, 0.0 }
 0x113   : > { %v738_v31 = vmax.f32 %v626_v25, 0.0  ;;  %v762_v32 = vmax.f32 %v722_v28, 0.0 }
 0x115   : > { %v767_v33 = vpack.c.bf16 %v738_v31, %v737_v30  ;;  %v2211_v34 = vpack.c.bf16 %v762_v32, %v761_v27 }
 0x116   : > { %v630_v35 = vpop.f32.mrb[12].mxu0  ;;  %v726_v36 = vpop.f32.mrb[12].mxu1 }
 0x117   : > { %v631_v37 = vadd.f32 %v2191_v44, %v630_v35  ;;  %v632_v38 = vpop.f32.mrb[13].mxu0  ;;  %1768 = vmatprep.mubr.msk.bf16.mxu1 %vm804_vm1, %v767_v33  ;;  %v727_v39 = vadd.f32 %v2191_v44, %v726_v36  ;;  %v728_v40 = vpop.f32.mrb[13].mxu1 }
 0x118   : > { %v633_v41 = vpop.f32.mrb[14].mxu0  ;;  %v729_v42 = vpop.f32.mrb[14].mxu1 }
 0x119   : > { %v634_v43 = vadd.f32 %v2191_v44, %v633_v41  ;;  %v635_v45 = vpop.f32.mrb[15].mxu0  ;;  %v763_v46 = vmax.f32 %v727_v39, 0.0  ;;  %v730_v47 = vadd.f32 %v2191_v44, %v729_v42  ;;  %v731_v48 = vpop.f32.mrb[15].mxu1  ;;  %v739_v49 = vmax.f32 %v631_v37, 0.0 }
 0x11b   : > { %v740_v50 = vmax.f32 %v634_v43, 0.0  ;;  %v764_v51 = vmax.f32 %v730_v47, 0.0 }
 0x11d   : > { %v768_v52 = vpack.c.bf16 %v740_v50, %v739_v49  ;;  %v2218_v53 = vpack.c.bf16 %v764_v51, %v763_v46 }
 0x11e   : > { %v638_v54 = vpop.f32.mrb[16].mxu0 }
 0x11f   : > { %v639_v55 = vadd.f32 %v2191_v44, %v638_v54  ;;  %v640_v56 = vpop.f32.mrb[17].mxu0  ;;  %1769 = vmatmul.mubr.msk.bf16.gmra.mrb[20].mxu1 %vm804_vm1, %v768_v52 }
 0x120   : > { %v641_v57 = vpop.f32.mrb[18].mxu0 }
 0x121   : > { %v642_v58 = vadd.f32 %v2191_v44, %v641_v57  ;;  %v643_v59 = vpop.f32.mrb[19].mxu0  ;;  %v741_v60 = vmax.f32 %v639_v55, 0.0 }
 0x123   : > { %v742_v61 = vmax.f32 %v642_v58, 0.0 }
 0x125   : > { %v769_v63 = vpack.c.bf16 %v742_v61, %v741_v60 }
 0x126   : > { %v646_v0 = vpop.f32.mrb[20].mxu0 }
 0x127   : > { %v647_v1 = vadd.f32 %v2191_v44, %v646_v0  ;;  %v648_v2 = vpop.f32.mrb[21].mxu0  ;;  %1772 = vmatprep.mubr.msk.bf16.mxu1 %vm804_vm1, %v769_v63 }
 0x128   : > { %v649_v3 = vpop.f32.mrb[22].mxu0 }
 0x129   : > { %v650_v4 = vadd.f32 %v2191_v44, %v649_v3  ;;  %v651_v5 = vpop.f32.mrb[23].mxu0  ;;  %v743_v6 = vmax.f32 %v647_v1, 0.0 }
 0x12a   : > { %v2256_v5 = vld [vmem:[%s2585_s4] ss:$0 sm:$0xff] }
 0x12b   : > { %v744_v7 = vmax.f32 %v650_v4, 0.0  ;;  %v1014_v4 = vlaneseq }
 0x12d   : > { %v770_v8 = vpack.c.bf16 %v744_v7, %v743_v6 }
 0x12e   : > { %v654_v9 = vpop.f32.mrb[24].mxu0 }
 0x12f   : > { %v655_v10 = vadd.f32 %v2191_v44, %v654_v9  ;;  %v656_v11 = vpop.f32.mrb[25].mxu0  ;;  %1773 = vmatmul.mubr.msk.bf16.gmra.mrb[24].mxu1 %vm804_vm1, %v770_v8 }
 0x130   : > { %v657_v12 = vpop.f32.mrb[26].mxu0 }
 0x131   : > { %v658_v13 = vadd.f32 %v2191_v44, %v657_v12  ;;  %v659_v14 = vpop.f32.mrb[27].mxu0  ;;  %v745_v15 = vmax.f32 %v655_v10, 0.0 }
 0x133   : > { %v746_v17 = vmax.f32 %v658_v13, 0.0 }
 0x135   : > { %v771_v18 = vpack.c.bf16 %v746_v17, %v745_v15 }
 0x136   : > { %v662_v19 = vpop.f32.mrb[28].mxu0 }
 0x137   : > { %v663_v20 = vadd.f32 %v2191_v44, %v662_v19  ;;  %v664_v21 = vpop.f32.mrb[29].mxu0  ;;  %1776 = vmatprep.mubr.msk.bf16.mxu1 %vm804_vm1, %v771_v18 }
 0x138   : > { %v665_v22 = vpop.f32.mrb[30].mxu0 }
 0x139   : > { %v666_v23 = vadd.f32 %v2191_v44, %v665_v22  ;;  %v667_v24 = vpop.f32.mrb[31].mxu0  ;;  %v747_v25 = vmax.f32 %v663_v20, 0.0 }
 0x13b   : > { %v748_v26 = vmax.f32 %v666_v23, 0.0 }
 0x13d   : > { %v772_v27 = vpack.c.bf16 %v748_v26, %v747_v25 }
 0x13e   : > { %v670_v28 = vpop.f32.mrb[32].mxu0 }
 0x13f   : > { %v671_v29 = vadd.f32 %v2191_v44, %v670_v28  ;;  %v672_v30 = vpop.f32.mrb[33].mxu0  ;;  %1777 = vmatmul.mubr.msk.bf16.gmra.mrb[28].mxu1 %vm804_vm1, %v772_v27 }
 0x140   : > { %v673_v31 = vpop.f32.mrb[34].mxu0 }
 0x141   : > { %v674_v32 = vadd.f32 %v2191_v44, %v673_v31  ;;  %v675_v33 = vpop.f32.mrb[35].mxu0  ;;  %v749_v35 = vmax.f32 %v671_v29, 0.0 }
 0x143   : > { %v750_v36 = vmax.f32 %v674_v32, 0.0 }
 0x145   : > { %v773_v37 = vpack.c.bf16 %v750_v36, %v749_v35 }
 0x146   : > { %v678_v38 = vpop.f32.mrb[36].mxu0 }
 0x147   : > { %v679_v39 = vadd.f32 %v2191_v44, %v678_v38  ;;  %v680_v40 = vpop.f32.mrb[37].mxu0  ;;  %1780 = vmatprep.mubr.msk.bf16.mxu1 %vm804_vm1, %v773_v37 }
 0x148   : > { %v681_v41 = vpop.f32.mrb[38].mxu0 }
 0x149   : > { %v682_v42 = vadd.f32 %v2191_v44, %v681_v41  ;;  %v683_v43 = vpop.f32.mrb[39].mxu0  ;;  %v751_v45 = vmax.f32 %v679_v39, 0.0 }
 0x14b   : > { %v752_v46 = vmax.f32 %v682_v42, 0.0 }
 0x14d   : > { %v774_v47 = vpack.c.bf16 %v752_v46, %v751_v45 }
 0x14e   : > { %v686_v48 = vpop.f32.mrb[40].mxu0 }
 0x14f   : > { %v687_v49 = vadd.f32 %v2191_v44, %v686_v48  ;;  %v688_v50 = vpop.f32.mrb[41].mxu0  ;;  %1781 = vmatmul.mubr.msk.bf16.gmra.mrb[32].mxu1 %vm804_vm1, %v774_v47 }
 0x150   : > { %v689_v51 = vpop.f32.mrb[42].mxu0 }
 0x151   : > { %v690_v52 = vadd.f32 %v2191_v44, %v689_v51  ;;  %v691_v54 = vpop.f32.mrb[43].mxu0  ;;  %v753_v55 = vmax.f32 %v687_v49, 0.0 }
 0x153   : > { %v754_v56 = vmax.f32 %v690_v52, 0.0 }
 0x155   : > { %v775_v57 = vpack.c.bf16 %v754_v56, %v753_v55 }
 0x156   : > { %v694_v58 = vpop.f32.mrb[44].mxu0 }
 0x157   : > { %v695_v59 = vadd.f32 %v2191_v44, %v694_v58  ;;  %v696_v60 = vpop.f32.mrb[45].mxu0  ;;  %1784 = vmatprep.mubr.msk.bf16.mxu1 %vm804_vm1, %v775_v57 }
 0x158   : > { %v697_v61 = vpop.f32.mrb[46].mxu0 }
 0x159   : > { %v698_v63 = vadd.f32 %v2191_v44, %v697_v61  ;;  %v699_v0 = vpop.f32.mrb[47].mxu0  ;;  %v755_v1 = vmax.f32 %v695_v59, 0.0  ;;  %v1015_v44 = vand.u32 127, %v1014_v4 }
 0x15b   : > { %v756_v2 = vmax.f32 %v698_v63, 0.0  ;;  %vm1016_vm2 = vcmp.ge.s32.totalorder %v1015_v44, 54  ;;  %vm1017_vm3 = vcmp.lt.s32.totalorder %v1015_v44, 63 }
 0x15c   : > { %vm2261_vm4 = vmand %vm1016_vm2, %vm1017_vm3 }
 0x15d   : > { %v776_v3 = vpack.c.bf16 %v756_v2, %v755_v1 }
 0x15f   : > { %1785 = vmatmul.mubr.msk.bf16.gmra.mrb[36].mxu1 %vm804_vm1, %v776_v3 }
 0x160   : > { %1788 = vmatprep.mubr.msk.bf16.mxu1 %vm804_vm1, %v2197_v62 }
 0x167   : > { %1789 = vmatmul.mubr.msk.bf16.gmra.mrb[40].mxu1 %vm804_vm1, %v2204_v16 }
 0x168   : > { %1792 = vmatprep.mubr.msk.bf16.mxu1 %vm804_vm1, %v2211_v34 }
 0x16f   : > { %1793 = vmatmul.mubr.msk.bf16.gmra.mrb[44].mxu1 %vm804_vm1, %v2218_v53 }
 0x1e2   : > { %v1766_v6 = vpop.f32.mrb[16].mxu1 }
 0x1e3   : > { %v2259_v62 = vadd.f32 %v1766_v6, %v2256_v5  ;;  %v887_v16 = vpop.f32.mrb[17].mxu1 }
 0x1e4   : > { %v2266_v34 = vadd.f32 %v2256_v5, %v887_v16  ;;  %v1767_v53 = vpop.f32.mrb[18].mxu1 }
 0x1e5   : > { %v1021_v8 = vsub.f32 0.0, %v2259_v62  ;;  %v2270_v9 = vadd.f32 %v1767_v53, %v2256_v5  ;;  %v890_v10 = vpop.f32.mrb[19].mxu1 }
 0x1e6   : > { %v1019_v11 = vsub.f32 0.0, %v2266_v34  ;;  %v2274_v12 = vadd.f32 %v2256_v5, %v890_v10 }
 0x1e7   : > { %v1053_v13 = vsel %vm2261_vm4, %v1021_v8, 0.0  ;;  %v1022_v14 = vsub.f32 0.0, %v2270_v9 }
 0x1e8   : > { %v1087_v15 = vmul.f32 1.442695, %v1053_v13  ;;  %v1051_v17 = vsel %vm2261_vm4, %v1019_v11, 0.0  ;;  %v1020_v18 = vsub.f32 0.0, %v2274_v12 }
 0x1e9   : > { %v1083_v19 = vmul.f32 1.442695, %v1051_v17  ;;  %v1054_v20 = vsel %vm2261_vm4, %v1022_v14, 0.0 }
 0x1ea   : > { %1898 = vpow2.f32 %v1087_v15  ;;  %v1089_v21 = vmul.f32 1.442695, %v1054_v20  ;;  %v1052_v22 = vsel %vm2261_vm4, %v1020_v18, 0.0 }
 0x1eb   : > { %1900 = vpow2.f32 %v1083_v19  ;;  %v1085_v23 = vmul.f32 1.442695, %v1052_v22 }
 0x1ec   : > { %1902 = vpow2.f32 %v1089_v21 }
 0x1ed   : > { %1904 = vpow2.f32 %v1085_v23 }
 0x1f2   : > { %v1770_v24 = vpop.f32.mrb[20].mxu1 }
 0x1f3   : > { %v2287_v25 = vadd.f32 %v1770_v24, %v2256_v5  ;;  %v903_v26 = vpop.f32.mrb[21].mxu1 }
 0x1f4   : > { %v1899_v27 = vpop.eup %1898  ;;  %v2290_v28 = vadd.f32 %v2256_v5, %v903_v26  ;;  %v1771_v29 = vpop.f32.mrb[22].mxu1 }
 0x1f5   : > { %v1901_v30 = vpop.eup %1900  ;;  %v1149_v31 = vadd.f32 1.0, %v1899_v27  ;;  %v1025_v32 = vsub.f32 0.0, %v2287_v25  ;;  %v2294_v33 = vadd.f32 %v1771_v29, %v2256_v5  ;;  %v906_v35 = vpop.f32.mrb[23].mxu1 }
 0x1f6   : > { %v1903_v36 = vpop.eup %1902  ;;  %v1147_v37 = vadd.f32 1.0, %v1901_v30  ;;  %v1023_v38 = vsub.f32 0.0, %v2290_v28  ;;  %v2298_v39 = vadd.f32 %v2256_v5, %v906_v35 }
 0x1f7   : > { %v1905_v40 = vpop.eup %1904  ;;  %1906 = vrcp.f32 %v1149_v31  ;;  %v1150_v41 = vadd.f32 1.0, %v1903_v36  ;;  %v1057_v42 = vsel %vm2261_vm4, %v1025_v32, 0.0  ;;  %v1026_v43 = vsub.f32 0.0, %v2294_v33 }
 0x1f8   : > { %1908 = vrcp.f32 %v1147_v37  ;;  %v1148_v45 = vadd.f32 1.0, %v1905_v40  ;;  %v1095_v46 = vmul.f32 1.442695, %v1057_v42  ;;  %v1055_v47 = vsel %vm2261_vm4, %v1023_v38, 0.0 }
 0x1f9   : > { %1910 = vrcp.f32 %v1150_v41  ;;  %v1091_v48 = vmul.f32 1.442695, %v1055_v47  ;;  %v1058_v49 = vsel %vm2261_vm4, %v1026_v43, 0.0  ;;  %v1024_v50 = vsub.f32 0.0, %v2298_v39 }
 0x1fa   : > { %1912 = vrcp.f32 %v1148_v45  ;;  %v1097_v51 = vmul.f32 1.442695, %v1058_v49 }
 0x1fb   : > { %1914 = vpow2.f32 %v1095_v46  ;;  %v1056_v52 = vsel %vm2261_vm4, %v1024_v50, 0.0 }
 0x1fc   : > { %1916 = vpow2.f32 %v1091_v48  ;;  %v1093_v54 = vmul.f32 1.442695, %v1056_v52 }
 0x1fd   : > { %1918 = vpow2.f32 %v1097_v51 }
 0x1fe   : > { %1920 = vpow2.f32 %v1093_v54 }
 0x201   : > { %v1907_v55 = vpop.eup %1906 }
 0x202   : > { %v1909_v56 = vpop.eup %1908  ;;  %v1774_v57 = vpop.f32.mrb[24].mxu1  ;;  %v1213_v63 = vsel %vm2261_vm4, %v1907_v55, %v2259_v62 }
 0x203   : > { %v1911_v58 = vpop.eup %1910  ;;  %v2312_v59 = vadd.f32 %v1774_v57, %v2256_v5  ;;  %v919_v60 = vpop.f32.mrb[25].mxu1  ;;  %v1211_v0 = vsel %vm2261_vm4, %v1909_v56, %v2266_v34 }
 0x204   : > { %v1913_v61 = vpop.eup %1912  ;;  %v1214_v1 = vsel %vm2261_vm4, %v1911_v58, %v2270_v9  ;;  %v2329_v2 = vadd.f32 %v2256_v5, %v919_v60  ;;  %v1775_v3 = vpop.f32.mrb[26].mxu1 }
 0x205   : > { %v1915_v4 = vpop.eup %1914  ;;  %v1655_v44 = vpack.c.bf16 %v1214_v1, %v1213_v63  ;;  %v1212_v6 = vsel %vm2261_vm4, %v1913_v61, %v2274_v12  ;;  %v1029_v62 = vsub.f32 0.0, %v2312_v59  ;;  %v2336_v16 = vadd.f32 %v1775_v3, %v2256_v5  ;;  %v922_v34 = vpop.f32.mrb[27].mxu1 }
 0x206   : > { %v1917_v53 = vpop.eup %1916  ;;  %v1650_v8 = vpack.c.bf16 %v1212_v6, %v1211_v0  ;;  %v1153_v9 = vadd.f32 1.0, %v1915_v4  ;;  %v1027_v10 = vsub.f32 0.0, %v2329_v2  ;;  %v2340_v11 = vadd.f32 %v2256_v5, %v922_v34 }
 0x207   : > { %v1919_v13 = vpop.eup %1918  ;;  %1727 = vst [vmem:[%s2323_s18 + $0x8] sm:$0xff] %v1655_v44   ;;  %v1151_v14 = vadd.f32 1.0, %v1917_v53  ;;  %v1061_v12 = vsel %vm2261_vm4, %v1029_v62, 0.0  ;;  %v1030_v15 = vsub.f32 0.0, %v2336_v16 }
 0x208   : > { %v1921_v17 = vpop.eup %1920  ;;  %1651 = vst [vmem:[%s2323_s18] sm:$0xff] %v1650_v8   ;;  %1922 = vrcp.f32 %v1153_v9  ;;  %v1154_v18 = vadd.f32 1.0, %v1919_v13  ;;  %v1103_v19 = vmul.f32 1.442695, %v1061_v12  ;;  %v1059_v20 = vsel %vm2261_vm4, %v1027_v10, 0.0 }
 0x209   : > { %1924 = vrcp.f32 %v1151_v14  ;;  %v1152_v21 = vadd.f32 1.0, %v1921_v17  ;;  %v1099_v22 = vmul.f32 1.442695, %v1059_v20  ;;  %v1062_v23 = vsel %vm2261_vm4, %v1030_v15, 0.0 }
 0x20a   : > { %1926 = vrcp.f32 %v1154_v18  ;;  %v1105_v24 = vmul.f32 1.442695, %v1062_v23  ;;  %v1028_v26 = vsub.f32 0.0, %v2340_v11 }
 0x20b   : > { %1928 = vrcp.f32 %v1152_v21 }
 0x20c   : > { %1930 = vpow2.f32 %v1103_v19  ;;  %v1060_v27 = vsel %vm2261_vm4, %v1028_v26, 0.0 }
 0x20d   : > { %1932 = vpow2.f32 %v1099_v22  ;;  %v1101_v29 = vmul.f32 1.442695, %v1060_v27 }
 0x20e   : > { %1934 = vpow2.f32 %v1105_v24 }
 0x20f   : > { %1936 = vpow2.f32 %v1101_v29 }
 0x212   : > { %v1923_v30 = vpop.eup %1922  ;;  %v1778_v31 = vpop.f32.mrb[28].mxu1 }
 0x213   : > { %v1925_v32 = vpop.eup %1924  ;;  %v2355_v35 = vadd.f32 %v1778_v31, %v2256_v5  ;;  %v935_v36 = vpop.f32.mrb[29].mxu1  ;;  %v1217_v38 = vsel %vm2261_vm4, %v1923_v30, %v2287_v25 }
 0x214   : > { %v1927_v37 = vpop.eup %1926  ;;  %v2361_v40 = vadd.f32 %v2256_v5, %v935_v36  ;;  %v1779_v41 = vpop.f32.mrb[30].mxu1  ;;  %v1215_v43 = vsel %vm2261_vm4, %v1925_v32, %v2290_v28 }
 0x215   : > { %v1929_v42 = vpop.eup %1928  ;;  %v1218_v45 = vsel %vm2261_vm4, %v1927_v37, %v2294_v33  ;;  %v1033_v46 = vsub.f32 0.0, %v2355_v35  ;;  %v2371_v47 = vadd.f32 %v1779_v41, %v2256_v5  ;;  %v938_v25 = vpop.f32.mrb[31].mxu1 }
 0x216   : > { %v1931_v48 = vpop.eup %1930  ;;  %v1665_v49 = vpack.c.bf16 %v1218_v45, %v1217_v38  ;;  %v1216_v50 = vsel %vm2261_vm4, %v1929_v42, %v2298_v39  ;;  %v1031_v28 = vsub.f32 0.0, %v2361_v40  ;;  %v2378_v51 = vadd.f32 %v2256_v5, %v938_v25 }
 0x217   : > { %v1933_v52 = vpop.eup %1932  ;;  %v1660_v33 = vpack.c.bf16 %v1216_v50, %v1215_v43  ;;  %v1157_v54 = vadd.f32 1.0, %v1931_v48  ;;  %v1065_v55 = vsel %vm2261_vm4, %v1033_v46, 0.0  ;;  %v1034_v56 = vsub.f32 0.0, %v2371_v47 }
 0x218   : > { %v1935_v57 = vpop.eup %1934  ;;  %1729 = vst [vmem:[%s2323_s18 + $0x18] sm:$0xff] %v1665_v49   ;;  %v1155_v58 = vadd.f32 1.0, %v1933_v52  ;;  %v1063_v60 = vsel %vm2261_vm4, %v1031_v28, 0.0  ;;  %v1032_v39 = vsub.f32 0.0, %v2378_v51  ;;  %v1111_v0 = vmul.f32 1.442695, %v1065_v55 }
 0x219   : > { %v1937_v61 = vpop.eup %1936  ;;  %1728 = vst [vmem:[%s2323_s18 + $0x10] sm:$0xff] %v1660_v33   ;;  %1938 = vrcp.f32 %v1157_v54  ;;  %v1158_v63 = vadd.f32 1.0, %v1935_v57  ;;  %v1066_v1 = vsel %vm2261_vm4, %v1034_v56, 0.0  ;;  %v1107_v4 = vmul.f32 1.442695, %v1063_v60 }
 0x21a   : > { %1940 = vrcp.f32 %v1155_v58  ;;  %v1156_v3 = vadd.f32 1.0, %v1937_v61  ;;  %v1064_v44 = vsel %vm2261_vm4, %v1032_v39, 0.0  ;;  %v1113_v6 = vmul.f32 1.442695, %v1066_v1 }
 0x21b   : > { %1942 = vrcp.f32 %v1158_v63  ;;  %v1109_v62 = vmul.f32 1.442695, %v1064_v44 }
 0x21c   : > { %1944 = vrcp.f32 %v1156_v3 }
 0x21d   : > { %1946 = vpow2.f32 %v1111_v0 }
 0x21e   : > { %1948 = vpow2.f32 %v1107_v4 }
 0x21f   : > { %1950 = vpow2.f32 %v1113_v6 }
 0x220   : > { %1952 = vpow2.f32 %v1109_v62 }
 0x222   : > { %v1782_v34 = vpop.f32.mrb[32].mxu1 }
 0x223   : > { %v1939_v53 = vpop.eup %1938  ;;  %v2393_v8 = vadd.f32 %v1782_v34, %v2256_v5  ;;  %v951_v9 = vpop.f32.mrb[33].mxu1 }
 0x224   : > { %v1941_v10 = vpop.eup %1940  ;;  %v2396_v13 = vadd.f32 %v2256_v5, %v951_v9  ;;  %v1783_v14 = vpop.f32.mrb[34].mxu1  ;;  %v1221_v15 = vsel %vm2261_vm4, %v1939_v53, %v2312_v59 }
 0x225   : > { %v1943_v12 = vpop.eup %1942  ;;  %v1037_v17 = vsub.f32 0.0, %v2393_v8  ;;  %v2403_v18 = vadd.f32 %v1783_v14, %v2256_v5  ;;  %v954_v19 = vpop.f32.mrb[35].mxu1  ;;  %v1219_v21 = vsel %vm2261_vm4, %v1941_v10, %v2329_v2 }
 0x226   : > { %v1945_v20 = vpop.eup %1944  ;;  %v1222_v22 = vsel %vm2261_vm4, %v1943_v12, %v2336_v16  ;;  %v1035_v23 = vsub.f32 0.0, %v2396_v13  ;;  %v2413_v59 = vadd.f32 %v2256_v5, %v954_v19 }
 0x227   : > { %v1947_v24 = vpop.eup %1946  ;;  %v1675_v26 = vpack.c.bf16 %v1222_v22, %v1221_v15  ;;  %v1220_v27 = vsel %vm2261_vm4, %v1945_v20, %v2340_v11  ;;  %v1069_v29 = vsel %vm2261_vm4, %v1037_v17, 0.0  ;;  %v1038_v2 = vsub.f32 0.0, %v2403_v18 }
 0x228   : > { %v1949_v30 = vpop.eup %1948  ;;  %v1670_v31 = vpack.c.bf16 %v1220_v27, %v1219_v21  ;;  %v1161_v16 = vadd.f32 1.0, %v1947_v24  ;;  %v1067_v32 = vsel %vm2261_vm4, %v1035_v23, 0.0  ;;  %v1036_v41 = vsub.f32 0.0, %v2413_v59 }
 0x229   : > { %v1951_v36 = vpop.eup %1950  ;;  %1731 = vst [vmem:[%s2323_s18 + $0x28] sm:$0xff] %v1675_v26   ;;  %v1159_v37 = vadd.f32 1.0, %v1949_v30  ;;  %v1070_v38 = vsel %vm2261_vm4, %v1038_v2, 0.0  ;;  %v1119_v43 = vmul.f32 1.442695, %v1069_v29 }
 0x22a   : > { %v1953_v11 = vpop.eup %1952  ;;  %1730 = vst [vmem:[%s2323_s18 + $0x20] sm:$0xff] %v1670_v31   ;;  %1954 = vrcp.f32 %v1161_v16  ;;  %v1162_v42 = vadd.f32 1.0, %v1951_v36  ;;  %v1115_v46 = vmul.f32 1.442695, %v1067_v32  ;;  %v1068_v25 = vsel %vm2261_vm4, %v1036_v41, 0.0 }
 0x22b   : > { %1956 = vrcp.f32 %v1159_v37  ;;  %v1160_v45 = vadd.f32 1.0, %v1953_v11  ;;  %v1121_v48 = vmul.f32 1.442695, %v1070_v38  ;;  %v1117_v49 = vmul.f32 1.442695, %v1068_v25 }
 0x22c   : > { %1958 = vrcp.f32 %v1162_v42 }
 0x22d   : > { %1960 = vrcp.f32 %v1160_v45 }
 0x22e   : > { %1962 = vpow2.f32 %v1119_v43 }
 0x22f   : > { %1964 = vpow2.f32 %v1115_v46 }
 0x230   : > { %1966 = vpow2.f32 %v1121_v48 }
 0x231   : > { %1968 = vpow2.f32 %v1117_v49 }
 0x232   : > { %v1786_v50 = vpop.f32.mrb[36].mxu1 }
 0x233   : > { %v2431_v28 = vadd.f32 %v1786_v50, %v2256_v5  ;;  %v967_v52 = vpop.f32.mrb[37].mxu1 }
 0x234   : > { %v1955_v33 = vpop.eup %1954  ;;  %v2434_v54 = vadd.f32 %v2256_v5, %v967_v52  ;;  %v1787_v55 = vpop.f32.mrb[38].mxu1 }
 0x235   : > { %v1957_v56 = vpop.eup %1956  ;;  %v1041_v57 = vsub.f32 0.0, %v2431_v28  ;;  %v2438_v58 = vadd.f32 %v1787_v55, %v2256_v5  ;;  %v970_v60 = vpop.f32.mrb[39].mxu1  ;;  %v1225_v61 = vsel %vm2261_vm4, %v1955_v33, %v2355_v35 }
 0x236   : > { %v1959_v39 = vpop.eup %1958  ;;  %v1039_v63 = vsub.f32 0.0, %v2434_v54  ;;  %v2445_v0 = vadd.f32 %v2256_v5, %v970_v60  ;;  %v1223_v3 = vsel %vm2261_vm4, %v1957_v56, %v2361_v40 }
 0x237   : > { %v1961_v1 = vpop.eup %1960  ;;  %v1226_v4 = vsel %vm2261_vm4, %v1959_v39, %v2371_v47  ;;  %v1073_v44 = vsel %vm2261_vm4, %v1041_v57, 0.0  ;;  %v1042_v35 = vsub.f32 0.0, %v2438_v58 }
 0x238   : > { %v1963_v6 = vpop.eup %1962  ;;  %v1685_v62 = vpack.c.bf16 %v1226_v4, %v1225_v61  ;;  %v1224_v34 = vsel %vm2261_vm4, %v1961_v1, %v2378_v51  ;;  %v1127_v53 = vmul.f32 1.442695, %v1073_v44  ;;  %v1071_v40 = vsel %vm2261_vm4, %v1039_v63, 0.0 }
 0x239   : > { %v1965_v9 = vpop.eup %1964  ;;  %v1680_v10 = vpack.c.bf16 %v1224_v34, %v1223_v3  ;;  %v1165_v14 = vadd.f32 1.0, %v1963_v6  ;;  %v1074_v47 = vsel %vm2261_vm4, %v1042_v35, 0.0  ;;  %v1123_v17 = vmul.f32 1.442695, %v1071_v40 }
 0x23a   : > { %v1967_v12 = vpop.eup %1966  ;;  %1733 = vst [vmem:[%s2323_s18 + $0x38] sm:$0xff] %v1685_v62   ;;  %v1163_v15 = vadd.f32 1.0, %v1965_v9  ;;  %1970 = vpow2.f32 %v1127_v53  ;;  %v1040_v19 = vsub.f32 0.0, %v2445_v0  ;;  %v1790_v20 = vpop.f32.mrb[40].mxu1  ;;  %v1129_v22 = vmul.f32 1.442695, %v1074_v47 }
 0x23b   : > { %v1969_v21 = vpop.eup %1968  ;;  %1732 = vst [vmem:[%s2323_s18 + $0x30] sm:$0xff] %v1680_v10   ;;  %1972 = vrcp.f32 %v1165_v14  ;;  %v1166_v51 = vadd.f32 1.0, %v1967_v12  ;;  %v2467_v23 = vadd.f32 %v1790_v20, %v2256_v5  ;;  %v983_v24 = vpop.f32.mrb[41].mxu1 }
 0x23c   : > { %1974 = vrcp.f32 %v1163_v15  ;;  %v1164_v26 = vadd.f32 1.0, %v1969_v21  ;;  %v1072_v27 = vsel %vm2261_vm4, %v1040_v19, 0.0  ;;  %v2472_v29 = vadd.f32 %v2256_v5, %v983_v24  ;;  %v1791_v2 = vpop.f32.mrb[42].mxu1 }
 0x23d   : > { %1976 = vrcp.f32 %v1166_v51  ;;  %v1125_v30 = vmul.f32 1.442695, %v1072_v27  ;;  %v1045_v31 = vsub.f32 0.0, %v2467_v23  ;;  %v2476_v16 = vadd.f32 %v1791_v2, %v2256_v5  ;;  %v986_v32 = vpop.f32.mrb[43].mxu1 }
 0x23e   : > { %1978 = vrcp.f32 %v1164_v26  ;;  %v1043_v36 = vsub.f32 0.0, %v2472_v29  ;;  %v2480_v37 = vadd.f32 %v2256_v5, %v986_v32 }
 0x23f   : > { %1980 = vpow2.f32 %v1123_v17  ;;  %v1077_v38 = vsel %vm2261_vm4, %v1045_v31, 0.0  ;;  %v1046_v41 = vsub.f32 0.0, %v2476_v16 }
 0x240   : > { %1982 = vpow2.f32 %v1129_v22  ;;  %v1135_v11 = vmul.f32 1.442695, %v1077_v38  ;;  %v1075_v42 = vsel %vm2261_vm4, %v1043_v36, 0.0  ;;  %v1044_v43 = vsub.f32 0.0, %v2480_v37 }
 0x241   : > { %1984 = vpow2.f32 %v1125_v30  ;;  %v1131_v45 = vmul.f32 1.442695, %v1075_v42  ;;  %v1078_v46 = vsel %vm2261_vm4, %v1046_v41, 0.0 }
 0x242   : > { %1986 = vpow2.f32 %v1135_v11  ;;  %v1137_v25 = vmul.f32 1.442695, %v1078_v46  ;;  %v1076_v48 = vsel %vm2261_vm4, %v1044_v43, 0.0  ;;  %v1794_v49 = vpop.f32.mrb[44].mxu1 }
 0x243   : > { %1988 = vpow2.f32 %v1131_v45  ;;  %v1133_v50 = vmul.f32 1.442695, %v1076_v48  ;;  %v2493_v52 = vadd.f32 %v1794_v49, %v2256_v5  ;;  %v999_v33 = vpop.f32.mrb[45].mxu1 }
 0x244   : > { %v1971_v55 = vpop.eup %1970  ;;  %1990 = vpow2.f32 %v1137_v25  ;;  %v2496_v56 = vadd.f32 %v2256_v5, %v999_v33  ;;  %v1795_v57 = vpop.f32.mrb[46].mxu1 }
 0x245   : > { %v1973_v60 = vpop.eup %1972  ;;  %v1169_v39 = vadd.f32 1.0, %v1971_v55  ;;  %1992 = vpow2.f32 %v1133_v50  ;;  %v1049_v61 = vsub.f32 0.0, %v2493_v52  ;;  %v2500_v63 = vadd.f32 %v1795_v57, %v2256_v5  ;;  %v1002_v1 = vpop.f32.mrb[47].mxu1 }
 0x246   : > { %v1975_v3 = vpop.eup %1974  ;;  %v1047_v4 = vsub.f32 0.0, %v2496_v56  ;;  %v2504_v44 = vadd.f32 %v2256_v5, %v1002_v1  ;;  %v1229_v6 = vsel %vm2261_vm4, %v1973_v60, %v2393_v8 }
 0x247   : > { %v1977_v35 = vpop.eup %1976  ;;  %v1227_v62 = vsel %vm2261_vm4, %v1975_v3, %v2396_v13  ;;  %1994 = vrcp.f32 %v1169_v39  ;;  %v1081_v34 = vsel %vm2261_vm4, %v1049_v61, 0.0  ;;  %v1050_v8 = vsub.f32 0.0, %v2500_v63 }
 0x248   : > { %v1979_v53 = vpop.eup %1978  ;;  %v1230_v5 = vsel %vm2261_vm4, %v1977_v35, %v2403_v18  ;;  %v1143_v40 = vmul.f32 1.442695, %v1081_v34  ;;  %v1079_v9 = vsel %vm2261_vm4, %v1047_v4, 0.0  ;;  %v1048_v12 = vsub.f32 0.0, %v2504_v44 }
 0x249   : > { %v1981_v10 = vpop.eup %1980  ;;  %v1695_v14 = vpack.c.bf16 %v1230_v5, %v1229_v6  ;;  %v1228_v13 = vsel %vm2261_vm4, %v1979_v53, %v2413_v59  ;;  %v1139_v47 = vmul.f32 1.442695, %v1079_v9  ;;  %v1082_v22 = vsel %vm2261_vm4, %v1050_v8, 0.0 }
 0x24a   : > { %v1983_v15 = vpop.eup %1982  ;;  %v1690_v17 = vpack.c.bf16 %v1228_v13, %v1227_v62  ;;  %v1167_v19 = vadd.f32 1.0, %v1981_v10  ;;  %1996 = vpow2.f32 %v1143_v40  ;;  %v1080_v26 = vsel %vm2261_vm4, %v1048_v12, 0.0 }
 0x24b   : > { %v1985_v18 = vpop.eup %1984  ;;  %1735 = vst [vmem:[%s2323_s18 + $0x48] sm:$0xff] %v1695_v14   ;;  %v1170_v20 = vadd.f32 1.0, %v1983_v15  ;;  %1998 = vpow2.f32 %v1139_v47  ;;  %v1145_v32 = vmul.f32 1.442695, %v1082_v22  ;;  %v1141_v38 = vmul.f32 1.442695, %v1080_v26 }
 0x24c   : > { %v1987_v21 = vpop.eup %1986  ;;  %1734 = vst [vmem:[%s2323_s18 + $0x40] sm:$0xff] %v1690_v17   ;;  %2000 = vrcp.f32 %v1167_v19  ;;  %v1168_v51 = vadd.f32 1.0, %v1985_v18 }
 0x24d   : > { %v1989_v24 = vpop.eup %1988  ;;  %2002 = vrcp.f32 %v1170_v20  ;;  %v1173_v59 = vadd.f32 1.0, %v1987_v21 }
 0x24e   : > { %v1991_v27 = vpop.eup %1990  ;;  %2004 = vrcp.f32 %v1168_v51  ;;  %v1171_v2 = vadd.f32 1.0, %v1989_v24 }
 0x24f   : > { %v1993_v30 = vpop.eup %1992  ;;  %2006 = vrcp.f32 %v1173_v59  ;;  %v1174_v31 = vadd.f32 1.0, %v1991_v27 }
 0x250   : > { %2008 = vrcp.f32 %v1171_v2  ;;  %v1172_v36 = vadd.f32 1.0, %v1993_v30 }
 0x251   : > { %v1995_v41 = vpop.eup %1994  ;;  %2010 = vrcp.f32 %v1174_v31 }
 0x252   : > { %2012 = vrcp.f32 %v1172_v36  ;;  %v1233_v25 = vsel %vm2261_vm4, %v1995_v41, %v2431_v28 }
 0x253   : > { %2014 = vpow2.f32 %v1145_v32 }
 0x254   : > { %v1997_v11 = vpop.eup %1996  ;;  %2016 = vpow2.f32 %v1141_v38 }
 0x255   : > { %v1999_v42 = vpop.eup %1998  ;;  %v1177_v39 = vadd.f32 1.0, %v1997_v11 }
 0x256   : > { %v2001_v43 = vpop.eup %2000  ;;  %v1175_v28 = vadd.f32 1.0, %v1999_v42 }
 0x257   : > { %v2003_v45 = vpop.eup %2002  ;;  %v1231_v50 = vsel %vm2261_vm4, %v2001_v43, %v2434_v54  ;;  %2018 = vrcp.f32 %v1177_v39 }
 0x258   : > { %v2005_v46 = vpop.eup %2004  ;;  %v1234_v48 = vsel %vm2261_vm4, %v2003_v45, %v2438_v58  ;;  %2020 = vrcp.f32 %v1175_v28 }
 0x259   : > { %v2007_v49 = vpop.eup %2006  ;;  %v1705_v33 = vpack.c.bf16 %v1234_v48, %v1233_v25  ;;  %v1232_v55 = vsel %vm2261_vm4, %v2005_v46, %v2445_v0 }
 0x25a   : > { %v2009_v57 = vpop.eup %2008  ;;  %v1700_v60 = vpack.c.bf16 %v1232_v55, %v1231_v50  ;;  %v1237_v58 = vsel %vm2261_vm4, %v2007_v49, %v2467_v23 }
 0x25b   : > { %v2011_v61 = vpop.eup %2010  ;;  %1737 = vst [vmem:[%s2323_s18 + $0x58] sm:$0xff] %v1705_v33   ;;  %v1235_v0 = vsel %vm2261_vm4, %v2009_v57, %v2472_v29 }
 0x25c   : > { %v2013_v1 = vpop.eup %2012  ;;  %1736 = vst [vmem:[%s2323_s18 + $0x50] sm:$0xff] %v1700_v60   ;;  %v1238_v54 = vsel %vm2261_vm4, %v2011_v61, %v2476_v16 }
 0x25d   : > { %v2015_v3 = vpop.eup %2014  ;;  %v1715_v4 = vpack.c.bf16 %v1238_v54, %v1237_v58  ;;  %v1236_v35 = vsel %vm2261_vm4, %v2013_v1, %v2480_v37 }
 0x25e   : > { %v2017_v6 = vpop.eup %2016  ;;  %v1710_v62 = vpack.c.bf16 %v1236_v35, %v1235_v0  ;;  %v1178_v34 = vadd.f32 1.0, %v2015_v3 }
 0x25f   : > { %1739 = vst [vmem:[%s2323_s18 + $0x68] sm:$0xff] %v1715_v4   ;;  %v1176_v23 = vadd.f32 1.0, %v2017_v6 }
 0x260   : > { %1738 = vst [vmem:[%s2323_s18 + $0x60] sm:$0xff] %v1710_v62   ;;  %2022 = vrcp.f32 %v1178_v34 }
 0x261   : > { %2024 = vrcp.f32 %v1176_v23  ;;  %v2019_v16 = vpop.eup %2018 }
 0x262   : > { %v2021_v53 = vpop.eup %2020  ;;  %v1241_v37 = vsel %vm2261_vm4, %v2019_v16, %v2493_v52 }
 0x263   : > { %v1239_v9 = vsel %vm2261_vm4, %v2021_v53, %v2496_v56 }
 0x26a   : > { %v2023_v29 = vpop.eup %2022 }
 0x26b   : > { %v2025_v5 = vpop.eup %2024  ;;  %v1242_v40 = vsel %vm2261_vm4, %v2023_v29, %v2500_v63 }
 0x26c   : > { %v1725_v8 = vpack.c.bf16 %v1242_v40, %v1241_v37  ;;  %v1240_v10 = vsel %vm2261_vm4, %v2025_v5, %v2504_v44 }
 0x26d   : > { %v1720_v14 = vpack.c.bf16 %v1240_v10, %v1239_v9 }
 0x26e   : > { %1741 = vst [vmem:[%s2323_s18 + $0x78] sm:$0xff] %v1725_v8  }
 0x26f   : > { %1740 = vst [vmem:[%s2323_s18 + $0x70] sm:$0xff] %v1720_v14  }
 0x270 PF: > { %s15_s20 = sadd.s32 1, %s2048_s20   ;;  %s2589_s18 = smov %s2044_s19 }
 0x271   : > { %p12_p5 = scmp.ge.s32.totalorder %s15_s20, 4   ;;  %s2590_s19 = smov %s2592_s21 }
 0x273   :  { %14 = sbr.rel (!%p12_p5) target bundleno = 2 (0x2), region = 70 }

</bundles_post_ra>
